<compile_context>
chip_gen: v5e
topology: v5e:2x2
jax: 0.10.0
libtpu: 0.0.40
codegen_flags: <defaults>
</compile_context>

<pallas_src>
import functools

import jax
import jax.numpy as jnp
from jax.experimental import pallas as pl
from jax.experimental.pallas import tpu as pltpu

_LANES = 128
_DEFAULT_BLOCK_ROWS = 8192   # 8192 x 128 x 4B = 4 MiB per f32 input tile
_LOG_CLAMP = -100.0          # PyTorch BCELoss clamps log() at -100


def _wbce_partials_kernel(p_ref, g_ref, o_ref, *, valid_rows_last):
    """Per-block partial sums for the weighted BCE loss.

    Output block (1, 3, 128):
      row 0: per-lane sum of gt                      (-> n_positive)
      row 1: per-lane sum of loss                    (-> total loss mass)
      row 2: per-lane sum of loss where gt >= 0.5    (-> positive loss mass)

    `valid_rows_last` is the number of valid rows in the final (ragged) grid
    block, or None when every block is completely covered by real data.
    """

    def emit(mask_rows):
        p = p_ref[...].astype(jnp.float32)
        g = g_ref[...].astype(jnp.float32)

        log_p = jnp.maximum(jnp.log(p), _LOG_CLAMP)
        log_1mp = jnp.maximum(jnp.log(1.0 - p), _LOG_CLAMP)
        # -(g*log_p + (1-g)*log_1mp) == -(g*(log_p - log_1mp) + log_1mp)
        loss = -(g * (log_p - log_1mp) + log_1mp)

        if mask_rows is not None:
            # Ragged final block: rows >= mask_rows hold unspecified (stale)
            # VMEM contents — zero their contributions (NaNs are never selected).
            row_ids = jax.lax.broadcasted_iota(jnp.int32, p.shape, 0)
            valid = row_ids < mask_rows
            g = jnp.where(valid, g, 0.0)
            loss = jnp.where(valid, loss, 0.0)

        pos_loss = jnp.where(g >= 0.5, loss, 0.0)

        sum_g = jnp.sum(g, axis=0, keepdims=True)          # (1, 128)
        sum_loss = jnp.sum(loss, axis=0, keepdims=True)     # (1, 128)
        sum_pos = jnp.sum(pos_loss, axis=0, keepdims=True)  # (1, 128)

        block = jnp.concatenate([sum_g, sum_loss, sum_pos], axis=0)  # (3, 128)
        o_ref[...] = block.reshape(1, 3, _LANES)

    if valid_rows_last is None:
        emit(None)
    else:
        is_last = pl.program_id(0) == pl.num_programs(0) - 1

        @pl.when(jnp.logical_not(is_last))
        def _():
            emit(None)

        @pl.when(is_last)
        def _():
            emit(valid_rows_last)


def _bce_partials_jax(p, g):
    """Tiny plain-JAX partials for the <128-element flat remainder."""
    p = p.astype(jnp.float32)
    g = g.astype(jnp.float32)
    log_p = jnp.maximum(jnp.log(p), _LOG_CLAMP)
    log_1mp = jnp.maximum(jnp.log(1.0 - p), _LOG_CLAMP)
    loss = -(g * (log_p - log_1mp) + log_1mp)
    pos_loss = jnp.where(g >= 0.5, loss, 0.0)
    return jnp.sum(g), jnp.sum(loss), jnp.sum(pos_loss)


@functools.partial(jax.jit, static_argnames=("block_rows",))
def weighted_bce_loss(prediction, gt, *, block_rows=_DEFAULT_BLOCK_ROWS):
    """Exact forward semantics of the PyTorch WeightedBCELoss module."""
    assert prediction.shape == gt.shape, "prediction and gt must have the same shape"
    assert block_rows > 0 and block_rows % 8 == 0, "block_rows must be a multiple of 8"

    total = gt.shape[0]                 # PyTorch: gt.size(0)
    numel = prediction.size

    p = prediction.reshape(-1)
    g = gt.reshape(-1)

    rows = numel // _LANES
    rem = numel - rows * _LANES

    # Flat remainder (< 128 elements): handled on a tiny slice in plain JAX
    # instead of padding (and thus copying) the whole array in HBM.
    if rem:
        tail_g, tail_loss, tail_pos = _bce_partials_jax(
            p[rows * _LANES:], g[rows * _LANES:]
        )
    else:
        tail_g = tail_loss = tail_pos = jnp.float32(0.0)

    if rows > 0:
        if rem:
            # Note: this prefix slice materializes one copy of the main body;
            # only hit when numel % 128 != 0 (common shapes avoid it entirely).
            p_main = p[: rows * _LANES]
            g_main = g[: rows * _LANES]
        else:
            p_main, g_main = p, g                 # free reshape, zero HBM copies
        p2 = p_main.reshape(rows, _LANES)
        g2 = g_main.reshape(rows, _LANES)

        br = min(block_rows, rows)                # full-dim block when rows < 8192
        num_blocks = (rows + br - 1) // br        # ragged grid, no padding
        valid_rows_last = rows - (num_blocks - 1) * br
        needs_mask = valid_rows_last != br

        kernel = functools.partial(
            _wbce_partials_kernel,
            valid_rows_last=valid_rows_last if needs_mask else None,
        )

        partials = pl.pallas_call(
            kernel,
            out_shape=jax.ShapeDtypeStruct((num_blocks, 3, _LANES), jnp.float32),
            grid_spec=pltpu.PrefetchScalarGridSpec(
                num_scalar_prefetch=0,
                grid=(num_blocks,),
                in_specs=[
                    pl.BlockSpec((br, _LANES), lambda i: (i, 0)),
                    pl.BlockSpec((br, _LANES), lambda i: (i, 0)),
                ],
                out_specs=pl.BlockSpec((1, 3, _LANES), lambda i: (i, 0, 0)),
            ),
            compiler_params=pltpu.CompilerParams(
                # Independent per-block partials; lets Mosaic shard row blocks
                # across TensorCores on v7x (neutral on single-TC v5e/v6e).
                # TODO(synk): benchmark pltpu.CORE_PARALLEL on v7x vs "parallel".
                dimension_semantics=("parallel",),
                # 2 inputs x 2 pipeline buffers x 4 MiB = 16 MiB at the default
                # tile; 48 MiB leaves headroom for larger block_rows while
                # staying inside v7x's 64 MiB per-TC VMEM.
                vmem_limit_bytes=48 * 1024 * 1024,
            ),
        )(p2, g2)

        sum_g = jnp.sum(partials[:, 0, :]) + tail_g
        sum_loss = jnp.sum(partials[:, 1, :]) + tail_loss
        sum_pos = jnp.sum(partials[:, 2, :]) + tail_pos
    else:
        sum_g, sum_loss, sum_pos = tail_g, tail_loss, tail_pos

    sum_neg = sum_loss - sum_pos
    inv_numel = jnp.float32(1.0 / numel)      # divide by element count, NOT num_programs
    mean_unweighted = sum_loss * inv_numel

    total_f = jnp.float32(total)
    w_negative = sum_g / total_f
    w_positive = 1.0 - w_negative
    mean_weighted = (w_positive * sum_pos + w_negative * sum_neg) * inv_numel

    # Note: n_positive (sum_g) uses f32 accumulation, matching torch float32
    # gt.sum(); exact-integer behaviour holds for up to ~2^24 positives.
    degenerate = (sum_g == 0.0) | (sum_g == total_f)
    return jnp.where(degenerate, mean_unweighted, mean_weighted)


def _weighted_bce_loss_ref(prediction, gt):
    """Pure-JAX reference replicating the PyTorch module."""
    log_p = jnp.maximum(jnp.log(prediction), _LOG_CLAMP)
    log_1mp = jnp.maximum(jnp.log(1.0 - prediction), _LOG_CLAMP)
    class_loss = -(gt * log_p + (1.0 - gt) * log_1mp)
    n_positive = gt.sum()
    total = gt.shape[0]
    w_negative = n_positive / total
    w_positive = 1.0 - w_negative
    weights = jnp.where(gt >= 0.5, w_positive, w_negative)
    weighted = jnp.mean(weights * class_loss)
    unweighted = jnp.mean(class_loss)
    return jnp.where((n_positive == 0) | (n_positive == total), unweighted, weighted)


if __name__ == "__main__":
    # Case 1: flat batch of probabilities (what `total = gt.size(0)` implies).
    k1p, k1g = jax.random.split(jax.random.PRNGKey(0))
    pred1 = jax.nn.sigmoid(jax.random.normal(k1p, (256,), dtype=jnp.float32))
    gt1 = (jax.random.uniform(k1g, (256,)) < 0.3).astype(jnp.float32)

    # Case 2: multi-block ragged grid (rows=2000, block_rows=512 -> 4 blocks,
    # last block masked in-kernel), no padding / copies anywhere.
    k2p, k2g = jax.random.split(jax.random.PRNGKey(1))
    pred2 = jax.nn.sigmoid(jax.random.normal(k2p, (1000, 256), dtype=jnp.float32))
    gt2 = (jax.random.uniform(k2g, (1000, 256)) < 0.1).astype(jnp.float32)

    # Case 3: numel % 128 != 0 (tail handled in wrapper) + degenerate branch
    # (no positive labels -> plain mean).
    k3p, _ = jax.random.split(jax.random.PRNGKey(2))
    pred3 = jax.nn.sigmoid(jax.random.normal(k3p, (300,), dtype=jnp.float32))
    gt3 = jnp.zeros((300,), jnp.float32)

    cases = [
        (pred1, gt1, {}),
        (pred2, gt2, {"block_rows": 512}),
        (pred3, gt3, {}),
    ]

    outs = []
    for pred, gt, kw in cases:
        out = weighted_bce_loss(pred, gt, **kw)
        outs.append(out)
    jax.block_until_ready(outs)

    for (pred, gt, _), out in zip(cases, outs):
        ref = _weighted_bce_loss_ref(pred, gt)
        assert jnp.allclose(out, ref, rtol=1e-4, atol=1e-6), (out, ref, pred.shape)

    print("KERNEL_OK")
</pallas_src>

<mosaic_0001>
module attributes {stable_mosaic.version = 11 : i64} {
  func.func @_wbce_partials_kernel(%arg0: i32, %arg1: memref<2x128xf32, #tpu.memory_space<vmem>>, %arg2: memref<2x128xf32, #tpu.memory_space<vmem>>, %arg3: memref<1x3x128xf32, #tpu.memory_space<vmem>>) attributes {dimension_semantics = [#tpu.dimension_semantics<parallel>], iteration_bounds = array<i64: 1>, scalar_prefetch = 0 : i64, scratch_operands = 0 : i64, tpu.core_type = #tpu.core_type<tc>, window_params = [{transform_indices = @transform_0, window_bounds = array<i64: 2, 128>}, {transform_indices = @transform_1, window_bounds = array<i64: 2, 128>}, {transform_indices = @transform_2, window_bounds = array<i64: 1, 3, 128>}]} {
    %c0 = arith.constant 0 : index
    %c0_0 = arith.constant 0 : index
    %0 = vector.load %arg1[%c0, %c0_0] : memref<2x128xf32, #tpu.memory_space<vmem>>, vector<2x128xf32>
    %c0_1 = arith.constant 0 : index
    %c0_2 = arith.constant 0 : index
    %1 = vector.load %arg2[%c0_1, %c0_2] : memref<2x128xf32, #tpu.memory_space<vmem>>, vector<2x128xf32>
    %2 = math.log %0 : vector<2x128xf32>
    %cst = arith.constant -1.000000e+02 : f32
    %3 = vector.broadcast %cst : f32 to vector<2x128xf32>
    %4 = arith.maximumf %2, %3 : vector<2x128xf32>
    %cst_3 = arith.constant 1.000000e+00 : f32
    %5 = vector.broadcast %cst_3 : f32 to vector<2x128xf32>
    %6 = arith.subf %5, %0 : vector<2x128xf32>
    %7 = math.log %6 : vector<2x128xf32>
    %cst_4 = arith.constant -1.000000e+02 : f32
    %8 = vector.broadcast %cst_4 : f32 to vector<2x128xf32>
    %9 = arith.maximumf %7, %8 : vector<2x128xf32>
    %10 = arith.subf %4, %9 : vector<2x128xf32>
    %11 = arith.mulf %1, %10 : vector<2x128xf32>
    %12 = arith.addf %11, %9 : vector<2x128xf32>
    %cst_5 = arith.constant 0.000000e+00 : f32
    %13 = vector.broadcast %cst_5 : f32 to vector<2x128xf32>
    %14 = arith.subf %13, %12 : vector<2x128xf32>
    %cst_6 = arith.constant 5.000000e-01 : f32
    %15 = vector.broadcast %cst_6 : f32 to vector<2x128xf32>
    %16 = arith.cmpf oge, %1, %15 : vector<2x128xf32>
    %cst_7 = arith.constant 0.000000e+00 : f32
    %17 = vector.broadcast %cst_7 : f32 to vector<2x128xf32>
    %18 = arith.select %16, %14, %17 : vector<2x128xi1>, vector<2x128xf32>
    %cst_8 = arith.constant dense<0.000000e+00> : vector<128xf32>
    %19 = vector.multi_reduction <add>, %1, %cst_8 [0] : vector<2x128xf32> to vector<128xf32>
    %20 = vector.shape_cast %19 : vector<128xf32> to vector<1x128xf32>
    %cst_9 = arith.constant dense<0.000000e+00> : vector<128xf32>
    %21 = vector.multi_reduction <add>, %14, %cst_9 [0] : vector<2x128xf32> to vector<128xf32>
    %22 = vector.shape_cast %21 : vector<128xf32> to vector<1x128xf32>
    %cst_10 = arith.constant dense<0.000000e+00> : vector<128xf32>
    %23 = vector.multi_reduction <add>, %18, %cst_10 [0] : vector<2x128xf32> to vector<128xf32>
    %24 = vector.shape_cast %23 : vector<128xf32> to vector<1x128xf32>
    %25 = tpu.concatenate %20, %22, %24 in 0 : vector<1x128xf32>, vector<1x128xf32>, vector<1x128xf32> -> vector<3x128xf32>
    %26 = vector.shape_cast %25 : vector<3x128xf32> to vector<1x3x128xf32>
    %c0_11 = arith.constant 0 : index
    %c0_12 = arith.constant 0 : index
    %c0_13 = arith.constant 0 : index
    %27 = vector.load %arg3[%c0_11, %c0_12, %c0_13] : memref<1x3x128xf32, #tpu.memory_space<vmem>>, vector<1x3x128xf32>
    tpu.vector_store %arg3[%c0_11, %c0_12, %c0_13], %26 {strides = array<i32>} : memref<1x3x128xf32, #tpu.memory_space<vmem>>, vector<1x3x128xf32>,
    return
  }
  func.func @transform_0(%arg0: i32) -> (i32, i32) {
    %c0_i32 = arith.constant 0 : i32
    %c0_i32_0 = arith.constant 0 : i32
    return %arg0, %c0_i32 : i32, i32
  }
  func.func @transform_1(%arg0: i32) -> (i32, i32) {
    %c0_i32 = arith.constant 0 : i32
    %c0_i32_0 = arith.constant 0 : i32
    return %arg0, %c0_i32 : i32, i32
  }
  func.func @transform_2(%arg0: i32) -> (i32, i32, i32) {
    %c0_i32 = arith.constant 0 : i32
    %c0_i32_0 = arith.constant 0 : i32
    %c0_i32_1 = arith.constant 0 : i32
    return %arg0, %c0_i32, %c0_i32_0 : i32, i32, i32
  }
}

</mosaic_0001>

<bundles_post_ra>
// kernel: weighted_bce_loss.1
= control target key start
LH: loop header
LB: loop body
LE: loop exit
PB: predicated region body
PF: predicated region fallthrough
CT: control target
= control target key end

     0   :  { %7 = vsyncpa [#allocation3], 0  ;;  %s102_s12 = smov [#allocation2]   ;;  %s131_s0 = inlined_call_operand.hbm [shape: f32[2,128], index: 0, kind: input, shape index: {}]   ;;  %s132_s1 = inlined_call_operand.vmem [shape: f32[2,128], index: 1, kind: input, shape index: {}]   ;;  %s133_s2 = inlined_call_operand.vmem [shape: f32[1,3,128], index: 2, kind: output, shape index: {}]  }
   0x1   :  { %s13_s11 = sshll.u32 %s131_s0, 4  ;;  %s15_s13 = sshll.u32 %s102_s12, 4  ;;  %s14_s11 = int_to_ptr.hbm [resolvable:$true] %s13_s11  ;;  %s16_s13 = int_to_ptr.vmem [resolvable:$true] %s15_s13 }
   0x2   :  { %18 = dma.hbm_to_vmem [thread:$0]  %s14_s11, 32, %s16_s13, [#allocation3]  }
   0x3   :  { %100 = dma.done.wait [#allocation3], 32  }
   0x4   :  { %101 = vsyncadd [#allocation3], 4294967264  ;;  %v25_v0 = vld [vmem:[#allocation2] sm:$0x3]  ;;  %vm40_vm0 = vcmask 1041408   ;;  %vm62_vm2 = vcmask 1040384  }
   0x5   :  { %72 = vlog2.f32 %v25_v0  ;;  %v30_v1 = vsub.f32 1.0, %v25_v0  ;;  %v26_v3 = vld [vmem:[%s132_s1] sm:$0x3] }
   0x6   :  { %v41_v5 = vsel %vm40_vm0, %v26_v3, 0.0  ;;  %vm38_vm1 = vcmp.ge.f32.partialorder %v26_v3, 0.5 }
   0x7   :  { %74 = vlog2.f32 %v30_v1  ;;  %v42_v9 = vrot.slane %v41_v5, 4 }
   0x9   :  { %v43_v12 = vadd.f32 %v42_v9, %v41_v5 }
   0xb   :  { %v73_v2 = vpop.eup %72  ;;  %v44_v15 = vrot.slane %v43_v12, 2 }
   0xc   :  { %v28_v4 = vmul.f32 0.6931472, %v73_v2 }
   0xd   :  { %v75_v6 = vpop.eup %74  ;;  %v45_v19 = vadd.f32 %v44_v15, %v43_v12 }
   0xe   :  { %v29_v7 = vmax.f32 %v28_v4, -100.0  ;;  %v32_v8 = vmul.f32 0.6931472, %v75_v6 }
   0xf   :  { %v46_v25 = vrot.slane %v45_v19, 1 }
  0x10   :  { %v33_v10 = vmax.f32 %v32_v8, -100.0 }
  0x11   :  { %v47_v30 = vadd.f32 %v46_v25, %v45_v19 }
  0x12   :  { %v34_v11 = vsub.f32 %v29_v7, %v33_v10 }
  0x14   :  { %v35_v13 = vmul.f32 %v34_v11, %v26_v3 }
  0x16   :  { %v36_v14 = vadd.f32 %v35_v13, %v33_v10 }
  0x18   :  { %v37_v16 = vsub.f32 0.0, %v36_v14 }
  0x1a   :  { %v39_v17 = vsel %vm38_vm1, %v37_v16, 0.0  ;;  %v48_v18 = vsel %vm40_vm0, %v37_v16, 0.0 }
  0x1b   :  { %v49_v20 = vrot.slane %v48_v18, 4  ;;  %v55_v21 = vsel %vm40_vm0, %v39_v17, 0.0 }
  0x1c   :  { %v56_v22 = vrot.slane %v55_v21, 4 }
  0x1d   :  { %v50_v23 = vadd.f32 %v49_v20, %v48_v18 }
  0x1e   :  { %v57_v24 = vadd.f32 %v56_v22, %v55_v21 }
  0x1f   :  { %v51_v26 = vrot.slane %v50_v23, 2 }
  0x20   :  { %v58_v27 = vrot.slane %v57_v24, 2 }
  0x21   :  { %v52_v28 = vadd.f32 %v51_v26, %v50_v23 }
  0x22   :  { %v59_v29 = vadd.f32 %v58_v27, %v57_v24 }
  0x23   :  { %v53_v31 = vrot.slane %v52_v28, 1 }
  0x24   :  { %v60_v32 = vrot.slane %v59_v29, 1 }
  0x25   :  { %v54_v33 = vadd.f32 %v53_v31, %v52_v28 }
  0x26   :  { %v61_v34 = vadd.f32 %v60_v32, %v59_v29 }
  0x27   :  { %v63_v35 = vsel %vm62_vm2, %v47_v30, %v54_v33 }
  0x28   :  { %v64_v36 = vsel %vm40_vm0, %v63_v35, %v61_v34 }
  0x29   :  { %65 = vst [vmem:[%s133_s2] sm:$0x7] %v64_v36 }
  0x2a   :  { %70 = vsyncpa [#allocation3], 1 }

</bundles_post_ra>
